<compile_context>
chip_gen: v5e
topology: v5e:2x2
jax: 0.10.0
libtpu: 0.0.40
codegen_flags: <defaults>
</compile_context>

<pallas_src>
import math
from functools import partial

import jax
import jax.numpy as jnp
from jax.experimental import pallas as pl
from jax.experimental.pallas import tpu as pltpu

_LN_EPS = 1e-5
_VMEM_LIMIT = 32 * 1024 * 1024   # safe on v5e (raises 16 MiB default) and v7x (64 MiB phys)
_TARGET_ROWS = 256               # target folded-batch rows per tile


def _layernorm(x, gamma, beta):
    mu = jnp.mean(x, axis=-1, keepdims=True)
    xc = x - mu
    var = jnp.mean(xc * xc, axis=-1, keepdims=True)
    return xc * jax.lax.rsqrt(var + _LN_EPS) * gamma + beta


def _gelu_tanh(x):
    # TODO(synk): PyTorch nn.GELU() default is the exact erf form; tanh approximation
    # used because erf lowering in Mosaic is not guaranteed (difference ~1e-3).
    c = 0.7978845608028654  # sqrt(2/pi)
    return 0.5 * x * (1.0 + jnp.tanh(c * (x + 0.044715 * x * x * x)))


def _pick_tile(total, target, align=1):
    """Largest tile <= target that divides total (preferring multiples of align)."""
    if total <= target:
        return total
    t = (target // align) * align
    while t >= align:
        if total % t == 0:
            return t
        t -= align
    return total


# --------------------------------------------------------------------------
# Kernels
# --------------------------------------------------------------------------
def _embed_gather_kernel(ids_ref, table_ref, o_ref, sem):
    """Row gather: ids (SMEM) index into the f32 table (HBM) via per-row DMA."""
    n = o_ref.shape[0]

    # TODO(synk): for large N, tile rows and bound in-flight DMAs; fine at demo sizes.
    @pl.loop(0, n)
    def _start(i):
        pltpu.make_async_copy(table_ref.at[ids_ref[i]], o_ref.at[i], sem).start()

    @pl.loop(0, n)
    def _wait(i):
        pltpu.make_async_copy(table_ref.at[ids_ref[i]], o_ref.at[i], sem).wait()


def _stack_kernel(x_ref, ln1_g_ref, ln1_b_ref, wqkv_ref, bqkv_ref, wo_ref, bo_ref,
                  ln2_g_ref, ln2_b_ref, w1_ref, b1_ref, w2_ref, b2_ref,
                  o_ref, ctx_ref, *, seq, num_heads, head_dim):
    """One grid step = one transformer layer applied to one batch tile.

    grid = (batch_tiles, depth); the residual stream is the output block
    (index map ignores the depth axis -> stays resident in VMEM across layers).
    """
    layer = pl.program_id(1)
    dim = num_heads * head_dim
    bf16 = jnp.bfloat16
    tb = o_ref.shape[0]
    rows = tb * seq

    @pl.when(layer == 0)
    def _():
        o_ref[...] = x_ref[...]

    x = o_ref[...].reshape(rows, dim)                                  # (TB*T, D) f32

    # ---- attention branch: x + W_o(MHA(LN1(x))) ---------------------------
    h = _layernorm(x, ln1_g_ref[0], ln1_b_ref[0])
    qkv = jnp.dot(h.astype(bf16), wqkv_ref[0],
                  preferred_element_type=jnp.float32) + bqkv_ref[0]    # (TB*T, 3D)
    scale = 1.0 / math.sqrt(head_dim)
    q = (qkv[:, 0 * dim:1 * dim] * scale).reshape(tb, seq, dim)        # scale folded into q
    k = qkv[:, 1 * dim:2 * dim].reshape(tb, seq, dim)
    v = qkv[:, 2 * dim:3 * dim].reshape(tb, seq, dim)

    for hh in range(num_heads):                                        # static unroll (H small)
        lo = hh * head_dim
        q_h = q[:, :, lo:lo + head_dim].astype(bf16)                   # (TB, T, hd)
        k_h = k[:, :, lo:lo + head_dim].astype(bf16)
        v_h = v[:, :, lo:lo + head_dim].astype(bf16)
        s = jnp.einsum('bqd,bkd->bqk', q_h, k_h,
                       preferred_element_type=jnp.float32)             # (TB, T, T)
        m = jnp.max(s, axis=-1, keepdims=True)
        e = jnp.exp(s - m)
        p = e * pl.reciprocal(jnp.sum(e, axis=-1, keepdims=True), approx=True)
        ctx_ref[:, :, lo:lo + head_dim] = jnp.einsum(
            'bqk,bkd->bqd', p.astype(bf16), v_h, preferred_element_type=jnp.float32)

    ctx = ctx_ref[...].reshape(rows, dim)
    x = x + jnp.dot(ctx.astype(bf16), wo_ref[0],
                    preferred_element_type=jnp.float32) + bo_ref[0]

    # ---- feed-forward branch: x + W2(GELU(W1(LN2(x)))) ---------------------
    h2 = _layernorm(x, ln2_g_ref[0], ln2_b_ref[0])
    f = jnp.dot(h2.astype(bf16), w1_ref[0],
                preferred_element_type=jnp.float32) + b1_ref[0]
    f = _gelu_tanh(f)
    f = jnp.dot(f.astype(bf16), w2_ref[0],                              # bf16 activation (fix)
                preferred_element_type=jnp.float32) + b2_ref[0]

    o_ref[...] = (x + f).reshape(tb, seq, dim).astype(o_ref.dtype)


def _head_kernel(x_ref, g_ref, b_ref, wh_ref, bh_ref, o_ref):
    h = _layernorm(x_ref[...], g_ref[...], b_ref[...])
    o_ref[...] = (jnp.dot(h.astype(jnp.bfloat16), wh_ref[...],
                          preferred_element_type=jnp.float32)
                  + bh_ref[...]).astype(o_ref.dtype)


# --------------------------------------------------------------------------
# One-time parameter preparation (transposes / fuses / casts / stacks weights)
# --------------------------------------------------------------------------
def prepare_params(params, *, num_heads):
    bf16 = jnp.bfloat16
    blocks = params["blocks"]

    def stack(fn):
        return jnp.stack([fn(b) for b in blocks])

    return {
        "num_heads": num_heads,
        "emb": params["emb"].astype(jnp.float32),                        # exact f32 table
        "ln1_g": stack(lambda b: b["ln1_g"].reshape(1, -1)),             # (L, 1, D)
        "ln1_b": stack(lambda b: b["ln1_b"].reshape(1, -1)),
        "wqkv": stack(lambda b: jnp.concatenate(
            [b["wq"].T, b["wk"].T, b["wv"].T], axis=1).astype(bf16)),    # (L, D, 3D)
        "bqkv": stack(lambda b: jnp.concatenate(
            [b["bq"], b["bk"], b["bv"]]).reshape(1, -1)),                # (L, 1, 3D)
        "wo": stack(lambda b: b["wo"].T.astype(bf16)),                   # (L, D, D)
        "bo": stack(lambda b: b["bo"].reshape(1, -1)),
        "ln2_g": stack(lambda b: b["ln2_g"].reshape(1, -1)),
        "ln2_b": stack(lambda b: b["ln2_b"].reshape(1, -1)),
        "w1": stack(lambda b: b["w1"].T.astype(bf16)),                   # (L, D, 4D)
        "b1": stack(lambda b: b["b1"].reshape(1, -1)),
        "w2": stack(lambda b: b["w2"].T.astype(bf16)),                   # (L, 4D, D)
        "b2": stack(lambda b: b["b2"].reshape(1, -1)),
        "ln_f_g": params["ln_f_g"].reshape(1, -1),
        "ln_f_b": params["ln_f_b"].reshape(1, -1),
        "w_head": params["w_head"].T.astype(bf16),                       # (D, V)
        "b_head": params["b_head"].reshape(1, -1),                       # (1, V)
    }


# --------------------------------------------------------------------------
# Forward
# --------------------------------------------------------------------------
def transformer_forward(idx, p):
    """idx: (B, T) int32 token ids, p: prepare_params(...) output. Returns (B, T, V)."""
    B, T = idx.shape
    V, D = p["emb"].shape
    H = p["num_heads"]
    hd = D // H
    L = p["wqkv"].shape[0]
    N = B * T

    # ---- embedding: DMA row gather (table stays exact f32) ----------------
    x = pl.pallas_call(
        _embed_gather_kernel,
        out_shape=jax.ShapeDtypeStruct((N, D), jnp.float32),
        in_specs=[pl.BlockSpec(memory_space=pltpu.MemorySpace.SMEM),
                  pl.BlockSpec(memory_space=pl.ANY)],
        out_specs=pl.BlockSpec(memory_space=pltpu.MemorySpace.VMEM),
        scratch_shapes=[pltpu.SemaphoreType.DMA],
        compiler_params=pltpu.CompilerParams(vmem_limit_bytes=_VMEM_LIMIT),
    )(idx.reshape(N).astype(jnp.int32), p["emb"])
    x = x.reshape(B, T, D)

    # ---- all transformer blocks in ONE pallas_call -------------------------
    TB = _pick_tile(B, max(1, _TARGET_ROWS // T))          # batch tile (rows = TB*T)
    grid = (B // TB, L)                                     # (parallel, arbitrary)

    def ws(shape):                                          # per-layer weight spec
        return pl.BlockSpec(shape, lambda b, l: (l, 0, 0))

    flops = L * (24 * N * D * D + 4 * N * T * D)
    trans = L * (N * T * H + 4 * N * D)
    bytes_acc = L * (24 * D * D + 8 * N * D) + 8 * N * D

    x = pl.pallas_call(
        partial(_stack_kernel, seq=T, num_heads=H, head_dim=hd),
        out_shape=jax.ShapeDtypeStruct((B, T, D), jnp.float32),
        grid=grid,
        in_specs=[
            pl.BlockSpec((TB, T, D), lambda b, l: (b, 0, 0)),   # x (read at l==0 only)
            ws((1, 1, D)), ws((1, 1, D)),                        # ln1 gamma/beta
            ws((1, D, 3 * D)), ws((1, 1, 3 * D)),                # fused QKV
            ws((1, D, D)), ws((1, 1, D)),                        # W_o
            ws((1, 1, D)), ws((1, 1, D)),                        # ln2 gamma/beta
            ws((1, D, 4 * D)), ws((1, 1, 4 * D)),                # W1
            ws((1, 4 * D, D)), ws((1, 1, D)),                    # W2
        ],
        out_specs=pl.BlockSpec((TB, T, D), lambda b, l: (b, 0, 0)),  # resident across l
        scratch_shapes=[pltpu.VMEM((TB, T, D), jnp.float32)],        # per-head ctx slab
        compiler_params=pltpu.CompilerParams(
            dimension_semantics=("parallel", "arbitrary"),
            vmem_limit_bytes=_VMEM_LIMIT),
        cost_estimate=pl.CostEstimate(flops=flops, transcendentals=trans,
                                      bytes_accessed=bytes_acc),
    )(x, p["ln1_g"], p["ln1_b"], p["wqkv"], p["bqkv"], p["wo"], p["bo"],
      p["ln2_g"], p["ln2_b"], p["w1"], p["b1"], p["w2"], p["b2"])

    # ---- final LayerNorm + LM head, tiled over (rows, vocab) ---------------
    xf = x.reshape(N, D)
    TM = _pick_tile(N, 256, align=8)
    TV = _pick_tile(V, 512, align=128)

    logits = pl.pallas_call(
        _head_kernel,
        out_shape=jax.ShapeDtypeStruct((N, V), jnp.float32),
        grid=(N // TM, V // TV),
        in_specs=[pl.BlockSpec((TM, D), lambda i, j: (i, 0)),
                  pl.BlockSpec((1, D), lambda i, j: (0, 0)),
                  pl.BlockSpec((1, D), lambda i, j: (0, 0)),
                  pl.BlockSpec((D, TV), lambda i, j: (0, j)),
                  pl.BlockSpec((1, TV), lambda i, j: (0, j))],
        out_specs=pl.BlockSpec((TM, TV), lambda i, j: (i, j)),
        compiler_params=pltpu.CompilerParams(
            dimension_semantics=("parallel", "parallel"),
            vmem_limit_bytes=_VMEM_LIMIT),
        cost_estimate=pl.CostEstimate(flops=2 * N * D * V, transcendentals=0,
                                      bytes_accessed=4 * N * D + 2 * D * V + 4 * N * V),
    )(xf, p["ln_f_g"], p["ln_f_b"], p["w_head"], p["b_head"])

    return logits.reshape(B, T, V)


# --------------------------------------------------------------------------
# Pure-JAX reference (mirrors the PyTorch forward; mm_dtype=bfloat16 mirrors
# the kernel's mixed-precision matmuls, mm_dtype=float32 is full precision).
# --------------------------------------------------------------------------
def _reference(idx, params, *, num_heads, mm_dtype=jnp.float32):
    x = params["emb"][idx]                                            # (B, T, D) exact f32
    B, T, D = x.shape
    hd = D // num_heads

    def mm(a, b):
        return jnp.matmul(a.astype(mm_dtype), b.astype(mm_dtype),
                          preferred_element_type=jnp.float32)

    def lin(a, W, b):
        return mm(a, W.T) + b

    def ln(a, g, b):
        mu = a.mean(-1, keepdims=True)
        var = ((a - mu) ** 2).mean(-1, keepdims=True)
        return (a - mu) / jnp.sqrt(var + _LN_EPS) * g + b

    for blk in params["blocks"]:
        h = ln(x, blk["ln1_g"], blk["ln1_b"])
        q = lin(h, blk["wq"], blk["bq"]).reshape(B, T, num_heads, hd).transpose(0, 2, 1, 3)
        k = lin(h, blk["wk"], blk["bk"]).reshape(B, T, num_heads, hd).transpose(0, 2, 1, 3)
        v = lin(h, blk["wv"], blk["bv"]).reshape(B, T, num_heads, hd).transpose(0, 2, 1, 3)
        s = jnp.einsum('bhqd,bhkd->bhqk', q.astype(mm_dtype), k.astype(mm_dtype),
                       preferred_element_type=jnp.float32) / math.sqrt(hd)
        p = jax.nn.softmax(s, axis=-1)
        ctx = jnp.einsum('bhqk,bhkd->bhqd', p.astype(mm_dtype), v.astype(mm_dtype),
                         preferred_element_type=jnp.float32)
        ctx = ctx.transpose(0, 2, 1, 3).reshape(B, T, D)
        x = x + lin(ctx, blk["wo"], blk["bo"])
        h2 = ln(x, blk["ln2_g"], blk["ln2_b"])
        x = x + lin(_gelu_tanh(lin(h2, blk["w1"], blk["b1"])), blk["w2"], blk["b2"])

    x = ln(x, params["ln_f_g"], params["ln_f_b"])
    return lin(x, params["w_head"], params["b_head"])


if __name__ == "__main__":
    DIM, HEADS, DEPTH, VOCAB = 32, 4, 2, 128
    B, T = 2, 8

    key = jax.random.PRNGKey(0)

    def uniform(k, shape, bound):
        return jax.random.uniform(k, shape, jnp.float32, -bound, bound)

    key, ek = jax.random.split(key)
    params = {"emb": jax.random.normal(ek, (VOCAB, DIM), jnp.float32)}

    blocks = []
    b_in = 1.0 / math.sqrt(DIM)
    b_ff = 1.0 / math.sqrt(4 * DIM)
    for _ in range(DEPTH):
        ks = jax.random.split(key, 17)
        key = ks[0]
        blocks.append({
            "wq": uniform(ks[1], (DIM, DIM), b_in), "bq": uniform(ks[2], (DIM,), b_in),
            "wk": uniform(ks[3], (DIM, DIM), b_in), "bk": uniform(ks[4], (DIM,), b_in),
            "wv": uniform(ks[5], (DIM, DIM), b_in), "bv": uniform(ks[6], (DIM,), b_in),
            "wo": uniform(ks[7], (DIM, DIM), b_in), "bo": uniform(ks[8], (DIM,), b_in),
            "w1": uniform(ks[9], (4 * DIM, DIM), b_in), "b1": uniform(ks[10], (4 * DIM,), b_in),
            "w2": uniform(ks[11], (DIM, 4 * DIM), b_ff), "b2": uniform(ks[12], (DIM,), b_ff),
            "ln1_g": 1.0 + uniform(ks[13], (DIM,), 0.1), "ln1_b": uniform(ks[14], (DIM,), 0.1),
            "ln2_g": 1.0 + uniform(ks[15], (DIM,), 0.1), "ln2_b": uniform(ks[16], (DIM,), 0.1),
        })
    params["blocks"] = blocks

    ks = jax.random.split(key, 6)
    params["ln_f_g"] = 1.0 + uniform(ks[1], (DIM,), 0.1)
    params["ln_f_b"] = uniform(ks[2], (DIM,), 0.1)
    params["w_head"] = uniform(ks[3], (VOCAB, DIM), b_in)
    params["b_head"] = uniform(ks[4], (VOCAB,), b_in)
    idx = jax.random.randint(ks[5], (B, T), 0, VOCAB, dtype=jnp.int32)

    prepped = prepare_params(params, num_heads=HEADS)           # one-time weight prep
    logits = jax.block_until_ready(transformer_forward(idx, prepped))
    assert logits.shape == (B, T, VOCAB)

    # Tight check vs a reference matching the kernel's bf16-matmul / f32-accum
    # precision (validates the structure of the computation).
    ref_bf16 = _reference(idx, params, num_heads=HEADS, mm_dtype=jnp.bfloat16)
    assert jnp.allclose(logits, ref_bf16, atol=1e-2, rtol=1e-2), \
        "mismatch vs bf16-matched reference"

    # Loose check vs the full-f32 (PyTorch-semantics) forward.
    ref_f32 = _reference(idx, params, num_heads=HEADS, mm_dtype=jnp.float32)
    assert jnp.allclose(logits, ref_f32, atol=1e-1, rtol=1e-1), \
        "mismatch vs f32 reference"

    print("KERNEL_OK")
</pallas_src>

<mosaic_0001>
module attributes {stable_mosaic.version = 11 : i64} {
  func.func @_embed_gather_kernel(%arg0: memref<16xi32, #tpu.memory_space<smem>>, %arg1: memref<128x32xf32, #tpu.memory_space<any>>, %arg2: memref<16x32xf32, #tpu.memory_space<vmem>>, %arg3: memref<!tpu.dma_semaphore, #tpu.memory_space<semaphore_mem>>) attributes {dimension_semantics = [], scalar_prefetch = 0 : i64, scratch_operands = 1 : i64, tpu.core_type = #tpu.core_type<tc>} {
    %c0_i32 = arith.constant 0 : i32
    %c16_i32 = arith.constant 16 : i32
    %0 = arith.addi %c0_i32, %c16_i32 : i32
    %c1_i32 = arith.constant 1 : i32
    scf.for %arg4 = %c0_i32 to %0 step %c1_i32  : i32 {
      %c1_i32_5 = arith.constant 1 : i32
      %2 = arith.muli %arg4, %c1_i32_5 : i32
      %c0_i32_6 = arith.constant 0 : i32
      %3 = arith.addi %c0_i32_6, %2 : i32
      %4 = arith.index_cast %3 : i32 to index
      %5 = memref.load %arg0[%4] : memref<16xi32, #tpu.memory_space<smem>>
      %c0_i32_7 = arith.constant 0 : i32
      %6 = tpu.memref_slice %arg1[%5, %c0_i32_7] : memref<128x32xf32, #tpu.memory_space<any>> -> memref<1x32xf32, #tpu.memory_space<any>>
      %7 = tpu.memref_squeeze %6 : memref<1x32xf32, #tpu.memory_space<any>> -> memref<32xf32, #tpu.memory_space<any>>
      %c0_i32_8 = arith.constant 0 : i32
      %8 = tpu.memref_slice %arg2[%3, %c0_i32_8] : memref<16x32xf32, #tpu.memory_space<vmem>> -> memref<1x32xf32, #tpu.memory_space<vmem>>
      %9 = tpu.memref_squeeze %8 : memref<1x32xf32, #tpu.memory_space<vmem>> -> memref<32xf32, #tpu.memory_space<vmem>>
      tpu.enqueue_dma source(%7 : memref<32xf32, #tpu.memory_space<any>>) target(%9 : memref<32xf32, #tpu.memory_space<vmem>>) target_semaphore(%arg3 : memref<!tpu.dma_semaphore, #tpu.memory_space<semaphore_mem>>)
    }
    %c16_i32_0 = arith.constant 16 : i32
    %c0_i32_1 = arith.constant 0 : i32
    %c16_i32_2 = arith.constant 16 : i32
    %1 = arith.addi %c0_i32_1, %c16_i32_2 : i32
    %c1_i32_3 = arith.constant 1 : i32
    scf.for %arg4 = %c0_i32_1 to %1 step %c1_i32_3  : i32 {
      %c1_i32_5 = arith.constant 1 : i32
      %2 = arith.muli %arg4, %c1_i32_5 : i32
      %c0_i32_6 = arith.constant 0 : i32
      %3 = arith.addi %c0_i32_6, %2 : i32
      %4 = arith.index_cast %3 : i32 to index
      %5 = memref.load %arg0[%4] : memref<16xi32, #tpu.memory_space<smem>>
      %c0_i32_7 = arith.constant 0 : i32
      %6 = tpu.memref_slice %arg1[%5, %c0_i32_7] : memref<128x32xf32, #tpu.memory_space<any>> -> memref<1x32xf32, #tpu.memory_space<any>>
      %7 = tpu.memref_squeeze %6 : memref<1x32xf32, #tpu.memory_space<any>> -> memref<32xf32, #tpu.memory_space<any>>
      %c0_i32_8 = arith.constant 0 : i32
      %8 = tpu.memref_slice %arg2[%3, %c0_i32_8] : memref<16x32xf32, #tpu.memory_space<vmem>> -> memref<1x32xf32, #tpu.memory_space<vmem>>
      %9 = tpu.memref_squeeze %8 : memref<1x32xf32, #tpu.memory_space<vmem>> -> memref<32xf32, #tpu.memory_space<vmem>>
      tpu.wait_dma2 semaphore(%arg3 : memref<!tpu.dma_semaphore, #tpu.memory_space<semaphore_mem>>) src(%7 : memref<32xf32, #tpu.memory_space<any>>) dst(%9 : memref<32xf32, #tpu.memory_space<vmem>>)
    }
    %c16_i32_4 = arith.constant 16 : i32
    return
  }
}

</mosaic_0001>

<bundles_post_ra>
// kernel: tpu_custom_call.1
= control target key start
LH: loop header
LB: loop body
LE: loop exit
PB: predicated region body
PF: predicated region fallthrough
CT: control target
= control target key end

     0   :  { %7 = vsyncpa [#allocation5], 0  ;;  %s223_s0 = inlined_call_operand.vmem [shape: s32[16], index: 0, kind: input, shape index: {}]   ;;  %s224_s1 = inlined_call_operand.vmem [shape: f32[128,32], index: 1, kind: input, shape index: {}]   ;;  %s225_s2 = inlined_call_operand.hbm [shape: f32[16,32], index: 2, kind: output, shape index: {}]  }
   0x1   :  { %8 = vsyncpa [#allocation4], 0  ;;  %s14_s11 = sshll.u32 %s223_s0, 4  ;;  %s195_s12 = smov [#allocation3]   ;;  %s15_s11 = int_to_ptr.vmem [resolvable:$true] %s14_s11 }
   0x2   :  { %17 = dma.vmem_to_smem %s15_s11, 16, %s195_s12, [#allocation5]  }
   0x3   :  { %181 = dma.done.wait [#allocation5], 16  }
   0x4   :  { %182 = vsyncadd [#allocation5], 4294967280 }
   0x5   :  { %22 = sfence }
   0x6   :  { %s187_s13 = smov 0  }
   0x7 LB: > { %s29_s14 = sld [smem:[#allocation3 + %s189_s13]]  ;;  %s31_s18 = scalar_lea.vmem [#allocation6], %s189_s13  ;;  %s189_s13 = sphi %s187_s13, %s28_s13  }
   0xd   : > { %s30_s17 = scalar_lea.vmem %s224_s1, %s29_s14 }
   0xe   : > { %v46_v0 = vld [vmem:[%s30_s17] sm:$0x1] }
   0xf   : > { %47 = vst [vmem:[%s31_s18] sm:$0x1] %v46_v0 }
  0x10   : > { %65 = vsyncadd [#allocation2], 16  ;;  %s28_s13 = sadd.s32 1, %s189_s13  }
  0x11   : > { %p25_p0 = scmp.ge.s32.totalorder %s28_s13, 16  }
  0x12   :  { %s191_s0 = smov (%p25_p0), 0  }
  0x13   :  { %27 = sbr.rel (!%p25_p0) target bundleno = 7 (0x7), region = 78 }
  0x18 LB: > { %183 = dma.done.wait [#allocation2], 16  ;;  %s193_s0 = sphi %s191_s0, %s71_s0  }
  0x19   : > { %184 = vsyncadd [#allocation2], 4294967280  ;;  %s71_s0 = sadd.s32 1, %s193_s0  }
  0x1a   : > { %p68_p1 = scmp.ge.s32.totalorder %s71_s0, 16  }
  0x1b   :  { %s81_s21 = sshll.u32 (%p68_p1), %s225_s2, 4  ;;  %s196_s22 = smov (%p68_p1), [#allocation6]   ;;  %s82_s21 = int_to_ptr.hbm [resolvable:$true] %s81_s21 }
  0x1c   :  { %70 = sbr.rel (!%p68_p1) target bundleno = 24 (0x18), region = 89  ;;  %s79_s23 = sshll.u32 (%p68_p1), %s196_s22, 4  ;;  %s80_s23 = int_to_ptr.vmem [resolvable:$true] %s79_s23 }
  0x1d   :  { %s197_s24 = smov (%p68_p1), 128   ;;  %s198_s25 = smov (%p68_p1), 8  }
  0x1e   :  { %87 = dma.vmem_to_hbm [thread:$0]  (%p68_p1), %s80_s23, 256, %s82_s21, [#allocation4], %s197_s24, %s197_s24, %s198_s25  }
  0x21   :  { %185 = dma.done.wait [#allocation4], 256  }
  0x22   :  { %186 = vsyncadd [#allocation4], 4294967040 }
  0x23   :  { %92 = vsyncpa [#allocation4], 1 }
  0x24   :  { %93 = vsyncpa [#allocation5], 1 }
  0x25   :  { %94 = vsyncmov [#allocation2] }
  0x28   :  { %s95_s1 = vpop.sfrf %94 }
  0x29   :  { %p116_p2 = scmp.ne.s32.totalorder %s95_s1, 0 }
  0x2b   :  { %99 = shalt.err (%p116_p2)  }

</bundles_post_ra>
